<compile_context>
chip_gen: v6e
topology: v6e:2x2x1
jax: 0.10.0
libtpu: 0.0.40
codegen_flags: <defaults>
</compile_context>

<pallas_src>
import functools
import math

import jax
import jax.numpy as jnp
from jax.experimental import pallas as pl
from jax.experimental.pallas import tpu as pltpu

SUBLANE = 8                    # f32 sublane tile; padded M of the transposed last matmul
LANE = 128                     # lane width
COMPUTE_DTYPE = jnp.bfloat16   # MXU input dtype for the first three layers


def _round_up(n, m):
    return ((n + m - 1) // m) * m


def sa_mlp_kernel(x_ref,
                  w1_ref, b1_ref,
                  w2_ref, b2_ref,
                  w3_ref, b3_ref,
                  w4t_ref, b4_ref,
                  out_ref):
    """One batch tile of the 4-layer MLP classifier, fully in VMEM.

    out_ref is (8, tb): the batch runs along lanes; only row 0 is meaningful.
    """
    # x arrives as f32 (no wrapper-side cast pass); cast to bf16 for the MXU here.
    x = x_ref[...].astype(COMPUTE_DTYPE)                                   # (tb, D)

    # Layer 1: (tb, D) @ (D, H) + (1, H) -> ReLU
    h1 = jnp.dot(x, w1_ref[...], preferred_element_type=jnp.float32) + b1_ref[...]
    h1 = jnp.maximum(h1, 0.0).astype(COMPUTE_DTYPE)

    # Layer 2: (tb, H) @ (H, 2H) + (1, 2H) -> ReLU
    h2 = jnp.dot(h1, w2_ref[...], preferred_element_type=jnp.float32) + b2_ref[...]
    h2 = jnp.maximum(h2, 0.0).astype(COMPUTE_DTYPE)

    # Layer 3: (tb, 2H) @ (2H, H_pad) + (1, H_pad) -> ReLU.  Columns >= H are zero
    # (zero-padded weights/bias), and h3 is kept in f32 for the transposed tail.
    h3 = jnp.dot(h2, w3_ref[...], preferred_element_type=jnp.float32) + b3_ref[...]
    h3 = jnp.maximum(h3, 0.0)                                              # (tb, H_pad) f32

    # Layer 4 (H -> 1) in transposed orientation so the logit is lane-dense:
    #   (8, H_pad) @ (H_pad, tb) -> (8, tb); only row 0 of w4t is the real weight.
    logit_t = jnp.dot(w4t_ref[...], h3.T, preferred_element_type=jnp.float32)
    logit_t = logit_t + b4_ref[0, 0]                                       # SMEM scalar bias

    # Numerically stable sigmoid with an exact reciprocal (only 8*tb elements).
    z = jnp.exp(-jnp.abs(logit_t))
    r = 1.0 / (1.0 + z)
    out_ref[...] = jnp.where(logit_t >= 0.0, r, 1.0 - r).astype(out_ref.dtype)


@functools.partial(jax.jit, static_argnames=("tile_b",))
def sa_forward(x, params, tile_b=1024):
    """x: [B, state_dim + action_dim] float32. Returns [B, 1] float32."""
    B, d_in = x.shape
    (w1, b1), (w2, b2), (w3, b3), (w4, b4) = params
    H = w1.shape[1]
    H2 = w2.shape[1]
    H_pad = _round_up(H, LANE)          # layer-3 output width padded for the transpose

    # Batch tile: 128-aligned, big enough to amortize per-step overhead.  If the whole
    # batch fits in one tile but is large, split into two tiles so v7x's 2 TensorCores
    # both get work (grid axis is "parallel").
    tile_b = max(LANE, _round_up(int(tile_b), LANE))
    b_aligned = _round_up(B, LANE)
    tb = min(tile_b, b_aligned)
    if b_aligned <= tb and B >= 4 * LANE:
        tb = _round_up(b_aligned // 2, LANE)
    B_pad = _round_up(B, tb)
    n_tiles = B_pad // tb

    # Pad batch only (x stays f32; the bf16 cast happens inside the kernel).
    x_p = x if B_pad == B else jnp.pad(x, ((0, B_pad - B), (0, 0)))

    # Weights: bf16 for the first three layers (f32 accumulation in-kernel).
    w1c = w1.astype(COMPUTE_DTYPE)
    w2c = w2.astype(COMPUTE_DTYPE)
    w3c = jnp.pad(w3, ((0, 0), (0, H_pad - H))).astype(COMPUTE_DTYPE)
    b3p = jnp.pad(b3, ((0, 0), (0, H_pad - H)))
    # Final layer kept f32, stored transposed + sublane-padded: (8, H_pad), row 0 real.
    w4t = jnp.pad(w4.astype(jnp.float32).T, ((0, SUBLANE - 1), (0, H_pad - H)))
    b4s = b4.reshape(1, 1).astype(jnp.float32)          # scalar bias, lives in SMEM

    # Replicated weight/bias blocks: constant block index -> fetched once, resident.
    def rep(shape):
        return pl.BlockSpec(shape, lambda i: (0, 0))

    weight_bytes = sum(int(a.size) * a.dtype.itemsize
                       for a in (w1c, b1, w2c, b2, w3c, b3p, w4t, b4s))
    cost = pl.CostEstimate(
        flops=int(2 * B_pad * (d_in * H + H * H2 + H2 * H_pad + H_pad * SUBLANE)),
        transcendentals=int(SUBLANE * B_pad),
        bytes_accessed=int(B_pad * d_in * 4 + SUBLANE * B_pad * 4 + weight_bytes),
    )

    out = pl.pallas_call(
        sa_mlp_kernel,
        out_shape=jax.ShapeDtypeStruct((SUBLANE, B_pad), jnp.float32),
        grid_spec=pltpu.PrefetchScalarGridSpec(
            num_scalar_prefetch=0,
            grid=(n_tiles,),
            in_specs=[
                pl.BlockSpec((tb, d_in), lambda i: (i, 0)),       # x tile (f32)
                rep((d_in, H)), rep((1, H)),                      # layer 1
                rep((H, H2)), rep((1, H2)),                       # layer 2
                rep((H2, H_pad)), rep((1, H_pad)),                # layer 3 (padded out)
                rep((SUBLANE, H_pad)),                            # layer 4 weight (transposed)
                pl.BlockSpec(memory_space=pltpu.MemorySpace.SMEM),  # layer 4 bias (scalar)
            ],
            out_specs=pl.BlockSpec((SUBLANE, tb), lambda i: (0, i)),
        ),
        compiler_params=pltpu.CompilerParams(
            dimension_semantics=("parallel",)),
        cost_estimate=cost,
    )(x_p, w1c, b1, w2c, b2, w3c, b3p, w4t, b4s)

    # Row 0 holds the real classifier output, batch along lanes.
    return out[0, :B].reshape(B, 1)


def init_linear(key, fan_in, fan_out):
    """Deterministic PyTorch-style Linear init; weight stored as [in, out]."""
    kw, kb = jax.random.split(key)
    bound = 1.0 / math.sqrt(fan_in)
    w = jax.random.uniform(kw, (fan_in, fan_out), jnp.float32, -bound, bound)
    b = jax.random.uniform(kb, (1, fan_out), jnp.float32, -bound, bound)
    return w, b


def init_sa_params(key, state_dim, action_dim, hidden_dim):
    d_in = state_dim + action_dim
    k1, k2, k3, k4 = jax.random.split(key, 4)
    return (
        init_linear(k1, d_in, hidden_dim),
        init_linear(k2, hidden_dim, hidden_dim * 2),
        init_linear(k3, hidden_dim * 2, hidden_dim),
        init_linear(k4, hidden_dim, 1),
    )


def sa_reference(x, params, compute_dtype=jnp.float32):
    """Pure-JAX reference. compute_dtype mirrors the kernel's MXU input dtype."""
    (w1, b1), (w2, b2), (w3, b3), (w4, b4) = params

    def lin(h, w, b):
        return jnp.dot(h.astype(compute_dtype), w.astype(compute_dtype),
                       preferred_element_type=jnp.float32) + b

    h = jnp.maximum(lin(x, w1, b1), 0.0)
    h = jnp.maximum(lin(h, w2, b2), 0.0)
    h = jnp.maximum(lin(h, w3, b3), 0.0)
    return jax.nn.sigmoid(lin(h, w4, b4))


if __name__ == "__main__":
    state_dim, action_dim, hidden_dim = 24, 8, 32
    d_in = state_dim + action_dim

    key = jax.random.PRNGKey(0)
    k_params, k_x1, k_x2 = jax.random.split(key, 3)
    params = init_sa_params(k_params, state_dim, action_dim, hidden_dim)

    # Small batch (single grid step, tile clamped to 128 with padded rows).
    x_small = jax.random.normal(k_x1, (8, d_in), jnp.float32)
    out_small = jax.block_until_ready(sa_forward(x_small, params))
    ref_bf16 = sa_reference(x_small, params, compute_dtype=COMPUTE_DTYPE)
    ref_f32 = sa_reference(x_small, params, compute_dtype=jnp.float32)
    assert out_small.shape == (8, 1)
    assert jnp.allclose(out_small, ref_bf16, atol=1e-2), "mismatch vs bf16 reference"
    assert jnp.allclose(out_small, ref_f32, atol=3e-2), "mismatch vs f32 reference"

    # Larger, non-multiple batch: exercises padding + the 2-tile parallel grid (v7x).
    x_big = jax.random.normal(k_x2, (1000, d_in), jnp.float32)
    out_big = jax.block_until_ready(sa_forward(x_big, params, tile_b=1024))
    ref_big_bf16 = sa_reference(x_big, params, compute_dtype=COMPUTE_DTYPE)
    ref_big_f32 = sa_reference(x_big, params, compute_dtype=jnp.float32)
    assert out_big.shape == (1000, 1)
    assert jnp.allclose(out_big, ref_big_bf16, atol=1e-2), "mismatch vs bf16 reference (big)"
    assert jnp.allclose(out_big, ref_big_f32, atol=3e-2), "mismatch vs f32 reference (big)"

    print("KERNEL_OK")
</pallas_src>

<mosaic_0001>
module attributes {stable_mosaic.version = 11 : i64} {
  func.func @sa_mlp_kernel(%arg0: i32, %arg1: memref<128x32xf32, #tpu.memory_space<vmem>>, %arg2: memref<32x32xbf16, #tpu.memory_space<vmem>>, %arg3: memref<1x32xf32, #tpu.memory_space<vmem>>, %arg4: memref<32x64xbf16, #tpu.memory_space<vmem>>, %arg5: memref<1x64xf32, #tpu.memory_space<vmem>>, %arg6: memref<64x128xbf16, #tpu.memory_space<vmem>>, %arg7: memref<1x128xf32, #tpu.memory_space<vmem>>, %arg8: memref<8x128xf32, #tpu.memory_space<vmem>>, %arg9: memref<1x1xf32, #tpu.memory_space<smem>>, %arg10: memref<8x128xf32, #tpu.memory_space<vmem>>) attributes {dimension_semantics = [#tpu.dimension_semantics<parallel>], iteration_bounds = array<i64: 1>, scalar_prefetch = 0 : i64, scratch_operands = 0 : i64, tpu.core_type = #tpu.core_type<tc>, window_params = [{transform_indices = @transform_0, window_bounds = array<i64: 128, 32>}, {pipeline_mode = #tpu.pipeline_mode<synchronous>, transform_indices = @transform_1, window_bounds = array<i64: 32, 32>}, {pipeline_mode = #tpu.pipeline_mode<synchronous>, transform_indices = @transform_2, window_bounds = array<i64: 1, 32>}, {pipeline_mode = #tpu.pipeline_mode<synchronous>, transform_indices = @transform_3, window_bounds = array<i64: 32, 64>}, {pipeline_mode = #tpu.pipeline_mode<synchronous>, transform_indices = @transform_4, window_bounds = array<i64: 1, 64>}, {pipeline_mode = #tpu.pipeline_mode<synchronous>, transform_indices = @transform_5, window_bounds = array<i64: 64, 128>}, {pipeline_mode = #tpu.pipeline_mode<synchronous>, transform_indices = @transform_6, window_bounds = array<i64: 1, 128>}, {pipeline_mode = #tpu.pipeline_mode<synchronous>, transform_indices = @transform_7, window_bounds = array<i64: 8, 128>}, {transform_indices = @transform_8, window_bounds = array<i64: 1, 1>}, {transform_indices = @transform_9, window_bounds = array<i64: 8, 128>}]} {
    %c0 = arith.constant 0 : index
    %c0_0 = arith.constant 0 : index
    %0 = vector.load %arg1[%c0, %c0_0] : memref<128x32xf32, #tpu.memory_space<vmem>>, vector<128x32xf32>
    %1 = arith.truncf %0 : vector<128x32xf32> to vector<128x32xbf16>
    %c0_1 = arith.constant 0 : index
    %c0_2 = arith.constant 0 : index
    %2 = vector.load %arg2[%c0_1, %c0_2] : memref<32x32xbf16, #tpu.memory_space<vmem>>, vector<32x32xbf16>
    %cst = arith.constant dense<0.000000e+00> : vector<128x32xf32>
    %3 = tpu.matmul %1, %2, %cst {dimension_numbers = #tpu.dot_dimension_numbers<[1], [0], [0], [1], [0, 0, 1, 1], [], []>} : vector<128x32xbf16>, vector<32x32xbf16>, vector<128x32xf32> -> vector<128x32xf32>
    %c0_3 = arith.constant 0 : index
    %c0_4 = arith.constant 0 : index
    %4 = vector.load %arg3[%c0_3, %c0_4] : memref<1x32xf32, #tpu.memory_space<vmem>>, vector<1x32xf32>
    %5 = vector.broadcast %4 : vector<1x32xf32> to vector<128x32xf32>
    %6 = arith.addf %3, %5 : vector<128x32xf32>
    %cst_5 = arith.constant 0.000000e+00 : f32
    %7 = vector.broadcast %cst_5 : f32 to vector<128x32xf32>
    %8 = arith.maximumf %6, %7 : vector<128x32xf32>
    %9 = arith.truncf %8 : vector<128x32xf32> to vector<128x32xbf16>
    %c0_6 = arith.constant 0 : index
    %c0_7 = arith.constant 0 : index
    %10 = vector.load %arg4[%c0_6, %c0_7] : memref<32x64xbf16, #tpu.memory_space<vmem>>, vector<32x64xbf16>
    %cst_8 = arith.constant dense<0.000000e+00> : vector<128x64xf32>
    %11 = tpu.matmul %9, %10, %cst_8 {dimension_numbers = #tpu.dot_dimension_numbers<[1], [0], [0], [1], [0, 0, 1, 1], [], []>} : vector<128x32xbf16>, vector<32x64xbf16>, vector<128x64xf32> -> vector<128x64xf32>
    %c0_9 = arith.constant 0 : index
    %c0_10 = arith.constant 0 : index
    %12 = vector.load %arg5[%c0_9, %c0_10] : memref<1x64xf32, #tpu.memory_space<vmem>>, vector<1x64xf32>
    %13 = vector.broadcast %12 : vector<1x64xf32> to vector<128x64xf32>
    %14 = arith.addf %11, %13 : vector<128x64xf32>
    %cst_11 = arith.constant 0.000000e+00 : f32
    %15 = vector.broadcast %cst_11 : f32 to vector<128x64xf32>
    %16 = arith.maximumf %14, %15 : vector<128x64xf32>
    %17 = arith.truncf %16 : vector<128x64xf32> to vector<128x64xbf16>
    %c0_12 = arith.constant 0 : index
    %c0_13 = arith.constant 0 : index
    %18 = vector.load %arg6[%c0_12, %c0_13] : memref<64x128xbf16, #tpu.memory_space<vmem>>, vector<64x128xbf16>
    %cst_14 = arith.constant dense<0.000000e+00> : vector<128x128xf32>
    %19 = tpu.matmul %17, %18, %cst_14 {dimension_numbers = #tpu.dot_dimension_numbers<[1], [0], [0], [1], [0, 0, 1, 1], [], []>} : vector<128x64xbf16>, vector<64x128xbf16>, vector<128x128xf32> -> vector<128x128xf32>
    %c0_15 = arith.constant 0 : index
    %c0_16 = arith.constant 0 : index
    %20 = vector.load %arg7[%c0_15, %c0_16] : memref<1x128xf32, #tpu.memory_space<vmem>>, vector<1x128xf32>
    %21 = vector.broadcast %20 : vector<1x128xf32> to vector<128x128xf32>
    %22 = arith.addf %19, %21 : vector<128x128xf32>
    %cst_17 = arith.constant 0.000000e+00 : f32
    %23 = vector.broadcast %cst_17 : f32 to vector<128x128xf32>
    %24 = arith.maximumf %22, %23 : vector<128x128xf32>
    %c0_18 = arith.constant 0 : index
    %c0_19 = arith.constant 0 : index
    %25 = vector.load %arg8[%c0_18, %c0_19] : memref<8x128xf32, #tpu.memory_space<vmem>>, vector<8x128xf32>
    %26 = tpu.transpose %24, [1, 0] : vector<128x128xf32> -> vector<128x128xf32>
    %cst_20 = arith.constant dense<0.000000e+00> : vector<8x128xf32>
    %27 = tpu.matmul %25, %26, %cst_20 {dimension_numbers = #tpu.dot_dimension_numbers<[1], [0], [0], [1], [0, 0, 1, 1], [], []>} : vector<8x128xf32>, vector<128x128xf32>, vector<8x128xf32> -> vector<8x128xf32>
    %c0_21 = arith.constant 0 : index
    %c0_22 = arith.constant 0 : index
    %28 = memref.load %arg9[%c0_21, %c0_22] : memref<1x1xf32, #tpu.memory_space<smem>>
    %29 = vector.broadcast %28 : f32 to vector<8x128xf32>
    %30 = arith.addf %27, %29 : vector<8x128xf32>
    %31 = math.absf %30 : vector<8x128xf32>
    %cst_23 = arith.constant 0.000000e+00 : f32
    %32 = vector.broadcast %cst_23 : f32 to vector<8x128xf32>
    %33 = arith.subf %32, %31 : vector<8x128xf32>
    %34 = math.exp %33 : vector<8x128xf32>
    %cst_24 = arith.constant 1.000000e+00 : f32
    %35 = vector.broadcast %cst_24 : f32 to vector<8x128xf32>
    %36 = arith.addf %35, %34 : vector<8x128xf32>
    %cst_25 = arith.constant 1.000000e+00 : f32
    %37 = vector.broadcast %cst_25 : f32 to vector<8x128xf32>
    %38 = arith.divf %37, %36 : vector<8x128xf32>
    %cst_26 = arith.constant 0.000000e+00 : f32
    %39 = vector.broadcast %cst_26 : f32 to vector<8x128xf32>
    %40 = arith.cmpf oge, %30, %39 : vector<8x128xf32>
    %cst_27 = arith.constant 1.000000e+00 : f32
    %41 = vector.broadcast %cst_27 : f32 to vector<8x128xf32>
    %42 = arith.subf %41, %38 : vector<8x128xf32>
    %43 = arith.select %40, %38, %42 : vector<8x128xi1>, vector<8x128xf32>
    %c0_28 = arith.constant 0 : index
    %c0_29 = arith.constant 0 : index
    %44 = vector.load %arg10[%c0_28, %c0_29] : memref<8x128xf32, #tpu.memory_space<vmem>>, vector<8x128xf32>
    tpu.vector_store %arg10[%c0_28, %c0_29], %43 {strides = array<i32>} : memref<8x128xf32, #tpu.memory_space<vmem>>, vector<8x128xf32>,
    return
  }
  func.func @transform_0(%arg0: i32) -> (i32, i32) {
    %c0_i32 = arith.constant 0 : i32
    %c0_i32_0 = arith.constant 0 : i32
    return %arg0, %c0_i32 : i32, i32
  }
  func.func @transform_1(%arg0: i32) -> (i32, i32) {
    %c0_i32 = arith.constant 0 : i32
    %c0_i32_0 = arith.constant 0 : i32
    %c0_i32_1 = arith.constant 0 : i32
    return %c0_i32, %c0_i32_0 : i32, i32
  }
  func.func @transform_2(%arg0: i32) -> (i32, i32) {
    %c0_i32 = arith.constant 0 : i32
    %c0_i32_0 = arith.constant 0 : i32
    %c0_i32_1 = arith.constant 0 : i32
    return %c0_i32, %c0_i32_0 : i32, i32
  }
  func.func @transform_3(%arg0: i32) -> (i32, i32) {
    %c0_i32 = arith.constant 0 : i32
    %c0_i32_0 = arith.constant 0 : i32
    %c0_i32_1 = arith.constant 0 : i32
    return %c0_i32, %c0_i32_0 : i32, i32
  }
  func.func @transform_4(%arg0: i32) -> (i32, i32) {
    %c0_i32 = arith.constant 0 : i32
    %c0_i32_0 = arith.constant 0 : i32
    %c0_i32_1 = arith.constant 0 : i32
    return %c0_i32, %c0_i32_0 : i32, i32
  }
  func.func @transform_5(%arg0: i32) -> (i32, i32) {
    %c0_i32 = arith.constant 0 : i32
    %c0_i32_0 = arith.constant 0 : i32
    %c0_i32_1 = arith.constant 0 : i32
    return %c0_i32, %c0_i32_0 : i32, i32
  }
  func.func @transform_6(%arg0: i32) -> (i32, i32) {
    %c0_i32 = arith.constant 0 : i32
    %c0_i32_0 = arith.constant 0 : i32
    %c0_i32_1 = arith.constant 0 : i32
    return %c0_i32, %c0_i32_0 : i32, i32
  }
  func.func @transform_7(%arg0: i32) -> (i32, i32) {
    %c0_i32 = arith.constant 0 : i32
    %c0_i32_0 = arith.constant 0 : i32
    %c0_i32_1 = arith.constant 0 : i32
    return %c0_i32, %c0_i32_0 : i32, i32
  }
  func.func @transform_8(%arg0: i32) -> (i32, i32) {
    %c0_i32 = arith.constant 0 : i32
    %c0_i32_0 = arith.constant 0 : i32
    %c0_i32_1 = arith.constant 0 : i32
    return %c0_i32, %c0_i32_0 : i32, i32
  }
  func.func @transform_9(%arg0: i32) -> (i32, i32) {
    %c0_i32 = arith.constant 0 : i32
    %c0_i32_0 = arith.constant 0 : i32
    return %c0_i32, %arg0 : i32, i32
  }
}

</mosaic_0001>

<bundles_post_ra>
// kernel: sa_forward.1
= control target key start
LH: loop header
LB: loop body
LE: loop exit
PB: predicated region body
PF: predicated region fallthrough
CT: control target
= control target key end

     0   :  { %vm81_vm0 = vcmask 261120   ;;  %vm434_vm1 = vcmask 523264   ;;  %vm858_vm2 = vmmov 0   ;;  %s1049_s1 = inlined_call_operand.vmem [shape: bf16[32,32], index: 1, kind: input, shape index: {}]   ;;  %s1050_s0 = inlined_call_operand.vmem [shape: f32[128,32], index: 0, kind: input, shape index: {}]   ;;  %s1051_s3 = inlined_call_operand.vmem [shape: bf16[32,64], index: 3, kind: input, shape index: {}]   ;;  %s1052_s5 = inlined_call_operand.vmem [shape: bf16[64,128], index: 5, kind: input, shape index: {}]   ;;  %s1053_s2 = inlined_call_operand.vmem [shape: f32[1,32], index: 2, kind: input, shape index: {}]   ;;  %s1054_s4 = inlined_call_operand.vmem [shape: f32[1,64], index: 4, kind: input, shape index: {}]   ;;  %s1055_s6 = inlined_call_operand.vmem [shape: f32[1,128], index: 6, kind: input, shape index: {}]   ;;  %s1056_s7 = inlined_call_operand.vmem [shape: f32[8,128], index: 7, kind: input, shape index: {}]   ;;  %s1057_s8 = inlined_call_operand.<no memory space> [shape: f32[1,1], index: 8, kind: input, shape index: {}]   ;;  %s1058_s9 = inlined_call_operand.vmem [shape: f32[8,128], index: 9, kind: output, shape index: {}]  }
   0x1   :  { %v845_v0 = vld [vmem:[%s1049_s1 + $0x8] sm:$0xff]   ;;  %v846_v1 = vld [vmem:[%s1049_s1] sm:$0xff]   ;;  %v36_v5 = vld [vmem:[%s1050_s0 + $0x10] sm:$0xff] }
   0x2   :  { %744 = vmatprep.subr.bf16.mxu0 %v845_v0  ;;  %v34_v2 = vld [vmem:[%s1050_s0] sm:$0xff]  ;;  %v35_v3 = vld [vmem:[%s1050_s0 + $0x8] sm:$0xff]  ;;  %v37_v6 = vld [vmem:[%s1050_s0 + $0x18] sm:$0xff] }
   0x3   :  { %745 = vmatpush3.bf16.msra.mxu0 %v845_v0  ;;  %v50_v4 = vpack.c.bf16 %v35_v3, %v34_v2  ;;  %v38_v7 = vld [vmem:[%s1050_s0 + $0x20] sm:$0xff]  ;;  %v39_v8 = vld [vmem:[%s1050_s0 + $0x28] sm:$0xff]  ;;  %v51_v9 = vpack.c.bf16 %v37_v6, %v36_v5  ;;  %v40_v11 = vld [vmem:[%s1050_s0 + $0x30] sm:$0xff] }
   0x4   :  { %746 = vmatprep.subr.bf16.mxu0 %v846_v1  ;;  %v52_v10 = vpack.c.bf16 %v39_v8, %v38_v7  ;;  %v41_v12 = vld [vmem:[%s1050_s0 + $0x38] sm:$0xff]  ;;  %v42_v13 = vld [vmem:[%s1050_s0 + $0x40] sm:$0xff]  ;;  %v43_v14 = vld [vmem:[%s1050_s0 + $0x48] sm:$0xff] }
   0x5   :  { %748 = vmatprep.mubr.msk.bf16.mxu0 %vm81_vm0, %v50_v4  ;;  %v53_v15 = vpack.c.bf16 %v41_v12, %v40_v11  ;;  %v54_v16 = vpack.c.bf16 %v43_v14, %v42_v13  ;;  %v44_v17 = vld [vmem:[%s1050_s0 + $0x50] sm:$0xff]  ;;  %v45_v18 = vld [vmem:[%s1050_s0 + $0x58] sm:$0xff]  ;;  %v46_v19 = vld [vmem:[%s1050_s0 + $0x60] sm:$0xff] }
   0x6   :  { %v47_v20 = vld [vmem:[%s1050_s0 + $0x68] sm:$0xff]  ;;  %v55_v21 = vpack.c.bf16 %v45_v18, %v44_v17  ;;  %v48_v23 = vld [vmem:[%s1050_s0 + $0x70] sm:$0xff]  ;;  %v49_v24 = vld [vmem:[%s1050_s0 + $0x78] sm:$0xff] }
   0x7   :  { %747 = vmatpush3.bf16.msra.mxu0 %v846_v1  ;;  %v56_v22 = vpack.c.bf16 %v47_v20, %v46_v19  ;;  %v57_v25 = vpack.c.bf16 %v49_v24, %v48_v23  ;;  %v847_v26 = vld [vmem:[%s1051_s3 + $0x8] sm:$0xff]   ;;  %v848_v27 = vld [vmem:[%s1051_s3] sm:$0xff]   ;;  %v849_v28 = vld [vmem:[%s1052_s5 + $0x18] sm:$0xff]  }
   0x8   :  { %764 = vmatprep.subr.bf16.mxu1 %v847_v26  ;;  %v850_v29 = vld [vmem:[%s1052_s5 + $0x10] sm:$0xff]   ;;  %784 = vmatprep.subr.bf16.mxu0 %v849_v28  ;;  %v851_v30 = vld [vmem:[%s1052_s5 + $0x8] sm:$0xff]   ;;  %v660_v33 = vld [vmem:[%s1053_s2] ss:$0 sm:$0xff] }
   0x9   :  { %765 = vmatpush3.bf16.msra.mxu1 %v847_v26  ;;  %v852_v24 = vld [vmem:[%s1052_s5] sm:$0xff]  }
   0xa   :  { %749 = vmatmul.mubr.msk.bf16.vlgmr.msra.gmra.mxu0 %vm81_vm0, %v51_v9  ;;  %766 = vmatprep.subr.bf16.mxu1 %v848_v27 }
   0xb   :  { %752 = vmatprep.mubr.msk.bf16.mxu0 %vm81_vm0, %v52_v10  ;;  %785 = vmatpush3.bf16.msra.mxu0 %v849_v28 }
   0xc   :  { %786 = vmatprep.subr.bf16.mxu0 %v850_v29 }
   0xd   :  { %767 = vmatpush3.bf16.msra.mxu1 %v848_v27  ;;  %v671_v27 = vld [vmem:[%s1054_s4] ss:$0 sm:$0xff] }
   0xf   :  { %787 = vmatpush3.bf16.msra.mxu0 %v850_v29 }
  0x10   :  { %788 = vmatprep.subr.bf16.mxu0 %v851_v30 }
  0x12   :  { %753 = vmatmul.mubr.msk.bf16.gmra.mxu0 %vm81_vm0, %v53_v15 }
  0x13   :  { %756 = vmatprep.mubr.msk.bf16.mxu0 %vm81_vm0, %v54_v16  ;;  %789 = vmatpush3.bf16.msra.mxu0 %v851_v30 }
  0x14   :  { %790 = vmatprep.subr.bf16.mxu0 %v852_v24 }
  0x17   :  { %791 = vmatpush3.bf16.msra.mxu0 %v852_v24 }
  0x1a   :  { %757 = vmatmul.mubr.msk.bf16.gmra.mxu0 %vm81_vm0, %v55_v21 }
  0x1b   :  { %760 = vmatprep.mubr.msk.bf16.mxu0 %vm81_vm0, %v56_v22 }
  0x22   :  { %761 = vmatmul.mubr.msk.bf16.gmra.mxu0 %vm81_vm0, %v57_v25 }
  0xca   :  { %v750_v31 = vpop.f32.mrf.mxu0 }
  0xcb   :  { %v149_v37 = vadd.f32 %v750_v31, %v660_v33 }
  0xcc   :  { %v140_v32 = vpop.f32.mrf.mxu0 }
  0xcd   :  { %v141_v35 = vadd.f32 %v660_v33, %v140_v32  ;;  %v205_v44 = vmax.f32 %v149_v37, 0.0 }
  0xce   :  { %v751_v34 = vpop.f32.mrf.mxu0 }
  0xcf   :  { %v152_v36 = vadd.f32 %v751_v34, %v660_v33  ;;  %v203_v42 = vmax.f32 %v141_v35, 0.0 }
  0xd0   :  { %v143_v38 = vpop.f32.mrf.mxu0 }
  0xd1   :  { %v144_v39 = vadd.f32 %v660_v33, %v143_v38  ;;  %v206_v40 = vmax.f32 %v152_v36, 0.0 }
  0xd2   :  { %v754_v41 = vpop.f32.mrf.mxu0 }
  0xd3   :  { %v204_v43 = vmax.f32 %v144_v39, 0.0  ;;  %v220_v47 = vpack.c.bf16 %v206_v40, %v205_v44  ;;  %v165_v51 = vadd.f32 %v754_v41, %v660_v33 }
  0xd4   :  { %v156_v45 = vpop.f32.mrf.mxu0 }
  0xd5   :  { %v219_v46 = vpack.c.bf16 %v204_v43, %v203_v42  ;;  %v157_v49 = vadd.f32 %v660_v33, %v156_v45  ;;  %v209_v58 = vmax.f32 %v165_v51, 0.0 }
  0xd6   :  { %v755_v48 = vpop.f32.mrf.mxu0 }
  0xd7   :  { %v168_v50 = vadd.f32 %v755_v48, %v660_v33  ;;  %768 = vmatprep.mubr.msk.bf16.mxu1 %vm81_vm0, %v219_v46  ;;  %v207_v56 = vmax.f32 %v157_v49, 0.0 }
  0xd8   :  { %v159_v52 = vpop.f32.mrf.mxu0  ;;  %769 = vmatmul.mubr.msk.bf16.vlgmr.msra.gmra.mxu1 %vm81_vm0, %v220_v47 }
  0xd9   :  { %v160_v53 = vadd.f32 %v660_v33, %v159_v52  ;;  %v210_v54 = vmax.f32 %v168_v50, 0.0 }
  0xda   :  { %v758_v55 = vpop.f32.mrf.mxu0 }
  0xdb   :  { %v208_v57 = vmax.f32 %v160_v53, 0.0  ;;  %v222_v61 = vpack.c.bf16 %v210_v54, %v209_v58  ;;  %v181_v1 = vadd.f32 %v758_v55, %v660_v33 }
  0xdc   :  { %v172_v59 = vpop.f32.mrf.mxu0 }
  0xdd   :  { %v221_v60 = vpack.c.bf16 %v208_v57, %v207_v56  ;;  %v173_v63 = vadd.f32 %v660_v33, %v172_v59  ;;  %v213_v8 = vmax.f32 %v181_v1, 0.0 }
  0xde   :  { %v759_v62 = vpop.f32.mrf.mxu0 }
  0xdf   :  { %v184_v0 = vadd.f32 %v759_v62, %v660_v33  ;;  %772 = vmatprep.mubr.msk.bf16.mxu1 %vm81_vm0, %v221_v60  ;;  %v211_v6 = vmax.f32 %v173_v63, 0.0 }
  0xe0   :  { %v175_v2 = vpop.f32.mrf.mxu0  ;;  %773 = vmatmul.mubr.msk.bf16.gmra.mxu1 %vm81_vm0, %v222_v61 }
  0xe1   :  { %v176_v3 = vadd.f32 %v660_v33, %v175_v2  ;;  %v214_v4 = vmax.f32 %v184_v0, 0.0 }
  0xe2   :  { %v762_v5 = vpop.f32.mrf.mxu0 }
  0xe3   :  { %v212_v7 = vmax.f32 %v176_v3, 0.0  ;;  %v224_v11 = vpack.c.bf16 %v214_v4, %v213_v8  ;;  %v197_v15 = vadd.f32 %v762_v5, %v660_v33 }
  0xe4   :  { %v188_v9 = vpop.f32.mrf.mxu0 }
  0xe5   :  { %v223_v10 = vpack.c.bf16 %v212_v7, %v211_v6  ;;  %v189_v13 = vadd.f32 %v660_v33, %v188_v9  ;;  %v217_v21 = vmax.f32 %v197_v15, 0.0 }
  0xe6   :  { %v763_v12 = vpop.f32.mrf.mxu0 }
  0xe7   :  { %v200_v14 = vadd.f32 %v763_v12, %v660_v33  ;;  %776 = vmatprep.mubr.msk.bf16.mxu1 %vm81_vm0, %v223_v10  ;;  %v215_v19 = vmax.f32 %v189_v13, 0.0 }
  0xe8   :  { %v191_v16 = vpop.f32.mrf.mxu0  ;;  %777 = vmatmul.mubr.msk.bf16.gmra.mxu1 %vm81_vm0, %v224_v11 }
  0xe9   :  { %v192_v17 = vadd.f32 %v660_v33, %v191_v16  ;;  %v218_v18 = vmax.f32 %v200_v14, 0.0 }
  0xeb   :  { %v216_v20 = vmax.f32 %v192_v17, 0.0  ;;  %v226_v23 = vpack.c.bf16 %v218_v18, %v217_v21  ;;  %v857_v18 = vmov 0.0  }
  0xec   :  { %808 = vmatprep.subr.mxu1 %v857_v18 }
  0xed   :  { %v225_v22 = vpack.c.bf16 %v216_v20, %v215_v19 }
  0xef   :  { %780 = vmatprep.mubr.msk.bf16.mxu1 %vm81_vm0, %v225_v22 }
  0xf0   :  { %781 = vmatmul.mubr.msk.bf16.gmra.mxu1 %vm81_vm0, %v226_v23 }
  0xf1   :  { %840 = vmatprep.mubr.msk.f32.mxu1 %vm858_vm2, %v857_v18 }
 0x198   :  { %v770_v25 = vpop.f32.mrf.mxu1 }
 0x199   :  { %v317_v31 = vadd.f32 %v770_v25, %v671_v27 }
 0x19a   :  { %v308_v26 = vpop.f32.mrf.mxu1 }
 0x19b   :  { %v309_v29 = vadd.f32 %v671_v27, %v308_v26  ;;  %v373_v38 = vmax.f32 %v317_v31, 0.0 }
 0x19c   :  { %v771_v28 = vpop.f32.mrf.mxu1 }
 0x19d   :  { %v320_v30 = vadd.f32 %v771_v28, %v671_v27  ;;  %v371_v36 = vmax.f32 %v309_v29, 0.0 }
 0x19e   :  { %v311_v32 = vpop.f32.mrf.mxu1 }
 0x19f   :  { %v312_v33 = vadd.f32 %v671_v27, %v311_v32  ;;  %v374_v34 = vmax.f32 %v320_v30, 0.0 }
 0x1a0   :  { %v774_v35 = vpop.f32.mrf.mxu1 }
 0x1a1   :  { %v372_v37 = vmax.f32 %v312_v33, 0.0  ;;  %v388_v41 = vpack.c.bf16 %v374_v34, %v373_v38  ;;  %v333_v45 = vadd.f32 %v774_v35, %v671_v27  ;;  %v682_v33 = vld [vmem:[%s1055_s6] ss:$0 sm:$0xff] }
 0x1a2   :  { %v324_v39 = vpop.f32.mrf.mxu1 }
 0x1a3   :  { %v387_v40 = vpack.c.bf16 %v372_v37, %v371_v36  ;;  %v325_v43 = vadd.f32 %v671_v27, %v324_v39  ;;  %v377_v52 = vmax.f32 %v333_v45, 0.0 }
 0x1a4   :  { %v775_v42 = vpop.f32.mrf.mxu1 }
 0x1a5   :  { %v336_v44 = vadd.f32 %v775_v42, %v671_v27  ;;  %792 = vmatprep.mubr.msk.bf16.mxu0 %vm434_vm1, %v387_v40  ;;  %v375_v50 = vmax.f32 %v325_v43, 0.0 }
 0x1a6   :  { %v327_v46 = vpop.f32.mrf.mxu1  ;;  %793 = vmatmul.mubr.msk.bf16.vlgmr.msra.gmra.mxu0 %vm434_vm1, %v388_v41 }
 0x1a7   :  { %v328_v47 = vadd.f32 %v671_v27, %v327_v46  ;;  %v378_v48 = vmax.f32 %v336_v44, 0.0 }
 0x1a8   :  { %v778_v49 = vpop.f32.mrf.mxu1 }
 0x1a9   :  { %v376_v51 = vmax.f32 %v328_v47, 0.0  ;;  %v390_v55 = vpack.c.bf16 %v378_v48, %v377_v52  ;;  %v349_v59 = vadd.f32 %v778_v49, %v671_v27 }
 0x1aa   :  { %v340_v53 = vpop.f32.mrf.mxu1 }
 0x1ab   :  { %v389_v54 = vpack.c.bf16 %v376_v51, %v375_v50  ;;  %v341_v57 = vadd.f32 %v671_v27, %v340_v53  ;;  %v381_v2 = vmax.f32 %v349_v59, 0.0 }
 0x1ac   :  { %v779_v56 = vpop.f32.mrf.mxu1 }
 0x1ad   :  { %v352_v58 = vadd.f32 %v779_v56, %v671_v27  ;;  %796 = vmatprep.mubr.msk.bf16.mxu0 %vm434_vm1, %v389_v54  ;;  %v379_v0 = vmax.f32 %v341_v57, 0.0 }
 0x1ae   :  { %v343_v60 = vpop.f32.mrf.mxu1  ;;  %797 = vmatmul.mubr.msk.bf16.gmra.mxu0 %vm434_vm1, %v390_v55 }
 0x1af   :  { %v344_v61 = vadd.f32 %v671_v27, %v343_v60  ;;  %v382_v62 = vmax.f32 %v352_v58, 0.0 }
 0x1b0   :  { %v782_v63 = vpop.f32.mrf.mxu1 }
 0x1b1   :  { %v380_v1 = vmax.f32 %v344_v61, 0.0  ;;  %v392_v5 = vpack.c.bf16 %v382_v62, %v381_v2  ;;  %v365_v9 = vadd.f32 %v782_v63, %v671_v27 }
 0x1b2   :  { %v356_v3 = vpop.f32.mrf.mxu1 }
 0x1b3   :  { %v391_v4 = vpack.c.bf16 %v380_v1, %v379_v0  ;;  %v357_v7 = vadd.f32 %v671_v27, %v356_v3  ;;  %v385_v15 = vmax.f32 %v365_v9, 0.0 }
 0x1b4   :  { %v783_v6 = vpop.f32.mrf.mxu1 }
 0x1b5   :  { %v368_v8 = vadd.f32 %v783_v6, %v671_v27  ;;  %800 = vmatprep.mubr.msk.bf16.mxu0 %vm434_vm1, %v391_v4  ;;  %v383_v13 = vmax.f32 %v357_v7, 0.0  ;;  %v572_v4 = vld [vmem:[%s1056_s7] sm:$0xff] }
 0x1b6   :  { %v359_v10 = vpop.f32.mrf.mxu1  ;;  %801 = vmatmul.mubr.msk.bf16.gmra.mxu0 %vm434_vm1, %v392_v5  ;;  %v574_v5 = vstv %s1057_s8 }
 0x1b7   :  { %v360_v11 = vadd.f32 %v671_v27, %v359_v10  ;;  %v386_v12 = vmax.f32 %v368_v8, 0.0 }
 0x1b9   :  { %v384_v14 = vmax.f32 %v360_v11, 0.0  ;;  %v394_v17 = vpack.c.bf16 %v386_v12, %v385_v15 }
 0x1bb   :  { %v393_v16 = vpack.c.bf16 %v384_v14, %v383_v13 }
 0x1bd   :  { %804 = vmatprep.mubr.msk.bf16.mxu0 %vm434_vm1, %v393_v16 }
 0x1be   :  { %805 = vmatmul.mubr.msk.bf16.gmra.mxu0 %vm434_vm1, %v394_v17 }
 0x266   :  { %v1013_v19 = vpop.f32.mrf.mxu0 }
 0x267   :  { %v502_v61 = vadd.f32 %v1013_v19, %v682_v33 }
 0x268   :  { %v1015_v20 = vpop.f32.mrf.mxu0 }
 0x269   :  { %v558_v63 = vmax.f32 %v502_v61, 0.0  ;;  %v494_v1 = vadd.f32 %v682_v33, %v1015_v20 }
 0x26a   :  { %v795_v21 = vpop.f32.mrf.mxu0 }
 0x26b   :  { %v505_v59 = vadd.f32 %v795_v21, %v682_v33  ;;  %v556_v3 = vmax.f32 %v494_v1, 0.0 }
 0x26c   :  { %v1017_v22 = vpop.f32.mrf.mxu0 }
 0x26d   :  { %v559_v62 = vmax.f32 %v505_v59, 0.0  ;;  %v497_v0 = vadd.f32 %v682_v33, %v1017_v22 }
 0x26e   :  { %v798_v23 = vpop.f32.mrf.mxu0 }
 0x26f   :  { %v518_v53 = vadd.f32 %v798_v23, %v682_v33  ;;  %v557_v2 = vmax.f32 %v497_v0, 0.0 }
 0x270   :  { %v509_v24 = vpop.f32.mrf.mxu0 }
 0x271   :  { %v562_v55 = vmax.f32 %v518_v53, 0.0  ;;  %v510_v57 = vadd.f32 %v682_v33, %v509_v24 }
 0x272   :  { %v799_v25 = vpop.f32.mrf.mxu0 }
 0x273   :  { %v521_v51 = vadd.f32 %v799_v25, %v682_v33  ;;  %v560_v60 = vmax.f32 %v510_v57, 0.0 }
 0x274   :  { %v512_v26 = vpop.f32.mrf.mxu0 }
 0x275   :  { %v563_v54 = vmax.f32 %v521_v51, 0.0  ;;  %v513_v56 = vadd.f32 %v682_v33, %v512_v26 }
 0x276   :  { %v802_v27 = vpop.f32.mrf.mxu0 }
 0x277   :  { %v534_v45 = vadd.f32 %v802_v27, %v682_v33  ;;  %v561_v58 = vmax.f32 %v513_v56, 0.0 }
 0x278   :  { %v525_v28 = vpop.f32.mrf.mxu0 }
 0x279   :  { %v566_v47 = vmax.f32 %v534_v45, 0.0  ;;  %v526_v49 = vadd.f32 %v682_v33, %v525_v28 }
 0x27a   :  { %v803_v29 = vpop.f32.mrf.mxu0 }
 0x27b   :  { %v537_v43 = vadd.f32 %v803_v29, %v682_v33  ;;  %v564_v52 = vmax.f32 %v526_v49, 0.0 }
 0x27c   :  { %v528_v30 = vpop.f32.mrf.mxu0 }
 0x27d   :  { %v567_v46 = vmax.f32 %v537_v43, 0.0  ;;  %v529_v48 = vadd.f32 %v682_v33, %v528_v30 }
 0x27e   :  { %v806_v31 = vpop.f32.mrf.mxu0 }
 0x27f   :  { %v550_v36 = vadd.f32 %v806_v31, %v682_v33  ;;  %v565_v50 = vmax.f32 %v529_v48, 0.0 }
 0x280   :  { %v541_v32 = vpop.f32.mrf.mxu0 }
 0x281   :  { %v570_v39 = vmax.f32 %v550_v36, 0.0  ;;  %v542_v41 = vadd.f32 %v682_v33, %v541_v32 }
 0x282   :  { %v807_v34 = vpop.f32.mrf.mxu0 }
 0x283   :  { %v553_v35 = vadd.f32 %v807_v34, %v682_v33  ;;  %v568_v44 = vmax.f32 %v542_v41, 0.0 }
 0x284   :  { %v544_v38 = vpop.f32.mrf.mxu0 }
 0x285   :  { %v571_v37 = vmax.f32 %v553_v35, 0.0  ;;  %v545_v40 = vadd.f32 %v682_v33, %v544_v38 }
 0x287   :  { %809 = vmatpush3.xpose.msra.mxu1 %v571_v37  ;;  %v569_v42 = vmax.f32 %v545_v40, 0.0 }
 0x288   :  { %810 = vmatprep.subr.mxu1 %v857_v18 }
 0x28b   :  { %811 = vmatpush3.xpose.msra.mxu1 %v570_v39 }
 0x28c   :  { %812 = vmatprep.subr.mxu1 %v857_v18 }
 0x28f   :  { %813 = vmatpush3.xpose.msra.mxu1 %v569_v42 }
 0x290   :  { %814 = vmatprep.subr.mxu1 %v857_v18 }
 0x293   :  { %815 = vmatpush3.xpose.msra.mxu1 %v568_v44 }
 0x294   :  { %816 = vmatprep.subr.mxu1 %v857_v18 }
 0x297   :  { %817 = vmatpush3.xpose.msra.mxu1 %v567_v46 }
 0x298   :  { %818 = vmatprep.subr.mxu1 %v857_v18 }
 0x29b   :  { %819 = vmatpush3.xpose.msra.mxu1 %v566_v47 }
 0x29c   :  { %820 = vmatprep.subr.mxu1 %v857_v18 }
 0x29f   :  { %821 = vmatpush3.xpose.msra.mxu1 %v565_v50 }
 0x2a0   :  { %822 = vmatprep.subr.mxu1 %v857_v18 }
 0x2a3   :  { %823 = vmatpush3.xpose.msra.mxu1 %v564_v52 }
 0x2a4   :  { %824 = vmatprep.subr.mxu1 %v857_v18 }
 0x2a7   :  { %825 = vmatpush3.xpose.msra.mxu1 %v563_v54 }
 0x2a8   :  { %826 = vmatprep.subr.mxu1 %v857_v18 }
 0x2ab   :  { %827 = vmatpush3.xpose.msra.mxu1 %v562_v55 }
 0x2ac   :  { %828 = vmatprep.subr.mxu1 %v857_v18 }
 0x2af   :  { %829 = vmatpush3.xpose.msra.mxu1 %v561_v58 }
 0x2b0   :  { %830 = vmatprep.subr.mxu1 %v857_v18 }
 0x2b3   :  { %831 = vmatpush3.xpose.msra.mxu1 %v560_v60 }
 0x2b4   :  { %832 = vmatprep.subr.mxu1 %v857_v18 }
 0x2b7   :  { %833 = vmatpush3.xpose.msra.mxu1 %v559_v62 }
 0x2b8   :  { %834 = vmatprep.subr.mxu1 %v857_v18 }
 0x2bb   :  { %835 = vmatpush3.xpose.msra.mxu1 %v558_v63 }
 0x2bc   :  { %836 = vmatprep.subr.mxu1 %v857_v18 }
 0x2bf   :  { %837 = vmatpush3.xpose.msra.mxu1 %v557_v2 }
 0x2c0   :  { %838 = vmatprep.subr.mxu1 %v857_v18 }
 0x2c3   :  { %839 = vmatpush3.xpose.msra.mxu1 %v556_v3 }
 0x2c6   :  { %841 = vmatmul.mubr.f32.vlgmr.msra.gmra.mxu1 %v572_v4 }
 0x386   :  { %v641_v6 = vpop.f32.mrf.mxu1 }
 0x387   :  { %v642_v7 = vadd.f32 %v641_v6, %v574_v5 }
 0x388   :  { %v842_v8 = vpop.f32.mrf.mxu1 }
 0x389   :  { %v645_v9 = vand.u32 2147483647, %v642_v7  ;;  %vm652_vm3 = vcmp.ge.f32.partialorder %v642_v7, 0.0 }
 0x38b   :  { %v646_v10 = vsub.f32 0.0, %v645_v9 }
 0x38d   :  { %v647_v11 = vmul.f32 1.442695, %v646_v10 }
 0x38f   :  { %853 = vpow2.f32 %v647_v11 }
 0x39c   :  { %v854_v12 = vpop.eup %853 }
 0x39d   :  { %v649_v13 = vadd.f32 1.0, %v854_v12 }
 0x39f   :  { %855 = vrcp.f32 %v649_v13 }
 0x3ac   :  { %v856_v14 = vpop.eup %855 }
 0x3ad   :  { %v653_v15 = vsub.f32 1.0, %v856_v14 }
 0x3af   :  { %v654_v16 = vsel %vm652_vm3, %v856_v14, %v653_v15 }
 0x3b0   :  { %655 = vst [vmem:[%s1058_s9] sm:$0xff] %v654_v16 }

</bundles_post_ra>
